<compile_context>
chip_gen: v5e
topology: v5e:2x2
jax: 0.10.0
libtpu: 0.0.40
codegen_flags: <defaults>
</compile_context>

<pallas_src>
import functools

import jax
import jax.numpy as jnp
from jax.experimental import pallas as pl
from jax.experimental.pallas import tpu as pltpu


def _round_up(x, m):
    return (x + m - 1) // m * m


def _conv3x3_kernel(w_ref, xp_ref, xc_ref, xn_ref, o_ref, *,
                    img_w, total_s, tile_s, halo_w):
    """One grid step of a 3x3 / stride 1 / pad 1 conv on a flattened image.

    w_ref : (9, Cout, Cin)   folded taps (resident, constant index_map)
    xp_ref: (Cin, halo_w)    last halo_w lanes of the previous spatial tile
    xc_ref: (Cin, tile_s)    current spatial tile (lane dim = flattened H*W)
    xn_ref: (Cin, halo_w)    first halo_w lanes of the next spatial tile
    o_ref : (Cout, tile_s)   lane-dense output tile (already NCHW order)
    """
    cout = o_ref.shape[0]
    s_idx = pl.program_id(1)

    # Global flattened spatial index of every output lane in this tile.
    g = s_idx * tile_s + jax.lax.broadcasted_iota(jnp.int32, (1, tile_s), 1)
    if img_w & (img_w - 1) == 0:                  # power-of-two W: plain AND
        col = jnp.bitwise_and(g, img_w - 1)
    else:
        col = jnp.remainder(g, img_w)

    # VMEM-only halo'ed view; the 9 tap views are static lane-offset slices
    # of it (no extra HBM traffic, no 9x patch tensor).
    xcat = jnp.concatenate([xp_ref[...], xc_ref[...], xn_ref[...]], axis=-1)

    acc = jnp.zeros((cout, tile_s), jnp.float32)
    t = 0
    for dh in (-1, 0, 1):
        for dw in (-1, 0, 1):
            off = dh * img_w + dw
            xs = xcat[:, halo_w + off: halo_w + off + tile_s]
            src = g + off
            valid = (src >= 0) & (src < total_s)   # row bounds + tile over-run
            if dw == -1:
                valid = valid & (col >= 1)         # left image border
            elif dw == 1:
                valid = valid & (col <= img_w - 2) # right image border
            # Mask BEFORE the dot: clamped halos / over-run garbage (even NaN)
            # can never reach a valid output column.
            xs = jnp.where(valid, xs, jnp.zeros((), xs.dtype))
            acc = acc + jnp.dot(w_ref[t], xs, preferred_element_type=jnp.float32)
            t += 1

    o_ref[...] = acc.astype(o_ref.dtype)


def _pick_tiles(S, W, Cin, Cout, in_sz, out_sz, N):
    """Pick (tile_s, halo_w): lane-dense, VMEM-budget aware, grid-length aware."""
    halo_w = _round_up(W + 2, 128)                 # >= W+1 halo, lane aligned
    try:
        vmem_cap = int(pltpu.get_tpu_info().vmem_capacity_bytes)
    except Exception:
        vmem_cap = 64 * 1024 * 1024                # conservative (v7x physical)
    # Keep the per-step working set well under every generation's budget
    # (v5e 16 MiB default scoped, v7x 32 MiB default / 64 MiB physical).
    budget = min(vmem_cap, 128 * 1024 * 1024) // 8

    def step_bytes(ts):
        blocks = 2 * (Cin * (ts + 2 * halo_w) * in_sz + Cout * ts * out_sz)
        temps = (Cin * (ts + 2 * halo_w) * in_sz      # xcat
                 + 2 * Cin * ts * in_sz               # slice + masked temp
                 + 2 * Cout * ts * 4)                 # f32 accumulator + dot out
        return blocks + temps + 9 * Cout * Cin * in_sz

    max_ts = max(halo_w, min(2048, _round_up(S, 128)))
    m = 1
    while (m + 1) * halo_w <= max_ts and step_bytes((m + 1) * halo_w) <= budget:
        m += 1
    # v7x: keep the grid long enough for both TensorCores and i+1 prefetch.
    while m > 1 and N * pl.cdiv(S, m * halo_w) < 8:
        m -= 1
    return m * halo_w, halo_w


@functools.partial(jax.jit, static_argnames=("compute_dtype",))
def overlap_patch_embed(x_nchw, weight_oihw, *, compute_dtype=jnp.bfloat16):
    """3x3 / stride 1 / pad 1 / no-bias conv (OverlapPatchEmbed.forward).

    x_nchw:      (N, Cin, H, W)
    weight_oihw: (Cout, Cin, 3, 3)   (PyTorch nn.Conv2d OIHW layout)
    returns:     (N, Cout, H, W) in x_nchw.dtype (bf16 staging, f32 accumulate)
    """
    N, Cin, H, W = x_nchw.shape
    Cout = weight_oihw.shape[0]
    S = H * W

    # Stage the dominant stream (x) and the weights in bf16; no pad passes.
    x_flat = x_nchw.reshape(N, Cin, S).astype(compute_dtype)
    # (Cout, Cin, 3, 3) -> (9, Cout, Cin): taps on the untiled leading dim so the
    # kernel slices them with static leading-dim indexing (no VMEM relayout).
    w_taps = (jnp.transpose(weight_oihw, (2, 3, 0, 1))
              .reshape(9, Cout, Cin).astype(compute_dtype))

    in_sz = jnp.dtype(compute_dtype).itemsize
    out_sz = jnp.dtype(x_nchw.dtype).itemsize
    tile_s, halo_w = _pick_tiles(S, W, Cin, Cout, in_sz, out_sz, N)
    assert tile_s % halo_w == 0 and tile_s % 128 == 0

    nt = pl.cdiv(S, tile_s)            # trailing tile may over-run S (masked)
    hb = tile_s // halo_w              # halo blocks per spatial tile
    n_hw_blocks = pl.cdiv(S, halo_w)

    kernel = functools.partial(_conv3x3_kernel, img_w=W, total_s=S,
                               tile_s=tile_s, halo_w=halo_w)

    flops = 2 * N * Cout * 9 * Cin * S
    bytes_accessed = (N * Cin * S * in_sz                     # main x stream
                      + 2 * N * nt * Cin * halo_w * in_sz     # halo re-reads
                      + N * Cout * S * out_sz                 # output
                      + 9 * Cout * Cin * in_sz)               # weights

    out = pl.pallas_call(
        kernel,
        out_shape=jax.ShapeDtypeStruct((N, Cout, S), x_nchw.dtype),
        grid_spec=pltpu.PrefetchScalarGridSpec(
            num_scalar_prefetch=0,
            grid=(N, nt),
            in_specs=[
                # Folded weights: tiny resident block (constant index_map).
                pl.BlockSpec((9, Cout, Cin), lambda n, s: (0, 0, 0)),
                # Left halo: last halo_w lanes of the previous tile (clamped at
                # s=0; the clamped lanes are masked in-kernel via global index).
                pl.BlockSpec((None, Cin, halo_w),
                             lambda n, s: (n, 0, jnp.maximum(s * hb - 1, 0))),
                # Current spatial tile (lane-dense, batch squeezed).
                pl.BlockSpec((None, Cin, tile_s), lambda n, s: (n, 0, s)),
                # Right halo: first halo_w lanes of the next tile (clamped at end).
                pl.BlockSpec((None, Cin, halo_w),
                             lambda n, s: (n, 0, jnp.minimum((s + 1) * hb,
                                                             n_hw_blocks - 1))),
            ],
            out_specs=pl.BlockSpec((None, Cout, tile_s), lambda n, s: (n, 0, s)),
        ),
        compiler_params=pltpu.CompilerParams(
            # Independent output tiles -> both axes parallel (v7x 2 TCs).
            dimension_semantics=("parallel", "parallel"),
            vmem_limit_bytes=32 * 1024 * 1024,
        ),
        cost_estimate=pl.CostEstimate(flops=flops, transcendentals=0,
                                      bytes_accessed=bytes_accessed),
    )(w_taps, x_flat, x_flat, x_flat)

    # (N, Cout, S) -> (N, Cout, H, W): split trailing dim only (already NCHW).
    return out.reshape(N, Cout, H, W)


if __name__ == "__main__":
    # Small shapes consistent with the module: batch=2, in_c=4, H=W=16, embed_dim=32.
    key = jax.random.PRNGKey(0)
    kx, kw = jax.random.split(key)
    N, Cin, H, W, Cout = 2, 4, 16, 16, 32

    x = jax.random.normal(kx, (N, Cin, H, W), dtype=jnp.float32)
    weight = jax.random.normal(kw, (Cout, Cin, 3, 3), dtype=jnp.float32) * 0.1

    out = overlap_patch_embed(x, weight)
    out = jax.block_until_ready(out)

    # Reference with the same bf16 staging (exact bf16 products, f32 accumulate),
    # matching nn.Conv2d(kernel=3, stride=1, padding=1, bias=False) semantics.
    xr = x.astype(jnp.bfloat16).astype(jnp.float32)
    wr = weight.astype(jnp.bfloat16).astype(jnp.float32)
    ref = jax.lax.conv_general_dilated(
        xr, wr, window_strides=(1, 1), padding=((1, 1), (1, 1)),
        dimension_numbers=("NCHW", "OIHW", "NCHW"),
        precision=jax.lax.Precision.HIGHEST)

    assert out.shape == (N, Cout, H, W)
    max_err = float(jnp.max(jnp.abs(out - ref)))
    assert jnp.allclose(out, ref, atol=1e-2, rtol=1e-2), max_err

    print("KERNEL_OK")
</pallas_src>

<mosaic_0001>
module attributes {stable_mosaic.version = 11 : i64} {
  func.func @_conv3x3_kernel(%arg0: i32, %arg1: i32, %arg2: memref<9x32x4xbf16, #tpu.memory_space<vmem>>, %arg3: memref<1x4x128xbf16, #tpu.memory_space<vmem>>, %arg4: memref<1x4x128xbf16, #tpu.memory_space<vmem>>, %arg5: memref<1x4x128xbf16, #tpu.memory_space<vmem>>, %arg6: memref<1x32x128xf32, #tpu.memory_space<vmem>>) attributes {dimension_semantics = [#tpu.dimension_semantics<parallel>, #tpu.dimension_semantics<parallel>], iteration_bounds = array<i64: 2, 2>, scalar_prefetch = 0 : i64, scratch_operands = 0 : i64, tpu.core_type = #tpu.core_type<tc>, window_params = [{pipeline_mode = #tpu.pipeline_mode<synchronous>, transform_indices = @transform_0, window_bounds = array<i64: 9, 32, 4>}, {transform_indices = @transform_1, window_bounds = array<i64: 1, 4, 128>}, {transform_indices = @transform_2, window_bounds = array<i64: 1, 4, 128>}, {transform_indices = @transform_3, window_bounds = array<i64: 1, 4, 128>}, {transform_indices = @transform_4, window_bounds = array<i64: 1, 32, 128>}]} {
    %c128_i32 = arith.constant 128 : i32
    %0 = arith.muli %arg1, %c128_i32 : i32
    %1 = tpu.iota {dimensions = array<i32: 1>} : vector<1x128xi32>
    %2 = vector.broadcast %0 : i32 to vector<1x128xi32>
    %3 = arith.addi %2, %1 : vector<1x128xi32>
    %c15_i32 = arith.constant 15 : i32
    %4 = vector.broadcast %c15_i32 : i32 to vector<1x128xi32>
    %5 = arith.andi %3, %4 : vector<1x128xi32>
    %c0 = arith.constant 0 : index
    %c0_0 = arith.constant 0 : index
    %c0_1 = arith.constant 0 : index
    %6 = vector.load %arg3[%c0, %c0_0, %c0_1] : memref<1x4x128xbf16, #tpu.memory_space<vmem>>, vector<1x4x128xbf16>
    %7 = vector.shape_cast %6 : vector<1x4x128xbf16> to vector<4x128xbf16>
    %c0_2 = arith.constant 0 : index
    %c0_3 = arith.constant 0 : index
    %c0_4 = arith.constant 0 : index
    %8 = vector.load %arg4[%c0_2, %c0_3, %c0_4] : memref<1x4x128xbf16, #tpu.memory_space<vmem>>, vector<1x4x128xbf16>
    %9 = vector.shape_cast %8 : vector<1x4x128xbf16> to vector<4x128xbf16>
    %c0_5 = arith.constant 0 : index
    %c0_6 = arith.constant 0 : index
    %c0_7 = arith.constant 0 : index
    %10 = vector.load %arg5[%c0_5, %c0_6, %c0_7] : memref<1x4x128xbf16, #tpu.memory_space<vmem>>, vector<1x4x128xbf16>
    %11 = vector.shape_cast %10 : vector<1x4x128xbf16> to vector<4x128xbf16>
    %12 = tpu.concatenate %7, %9, %11 in 1 : vector<4x128xbf16>, vector<4x128xbf16>, vector<4x128xbf16> -> vector<4x384xbf16>
    %cst = arith.constant 0.000000e+00 : f32
    %13 = vector.broadcast %cst : f32 to vector<32x128xf32>
    %14 = vector.extract_strided_slice %12 {offsets = [0, 111], sizes = [4, 128], strides = [1, 1]} : vector<4x384xbf16> to vector<4x128xbf16>
    %c-17_i32 = arith.constant -17 : i32
    %15 = vector.broadcast %c-17_i32 : i32 to vector<1x128xi32>
    %16 = arith.addi %3, %15 : vector<1x128xi32>
    %c0_i32 = arith.constant 0 : i32
    %17 = vector.broadcast %c0_i32 : i32 to vector<1x128xi32>
    %18 = arith.cmpi sge, %16, %17 : vector<1x128xi32>
    %c256_i32 = arith.constant 256 : i32
    %19 = vector.broadcast %c256_i32 : i32 to vector<1x128xi32>
    %20 = arith.cmpi slt, %16, %19 : vector<1x128xi32>
    %21 = arith.andi %18, %20 : vector<1x128xi1>
    %c1_i32 = arith.constant 1 : i32
    %22 = vector.broadcast %c1_i32 : i32 to vector<1x128xi32>
    %23 = arith.cmpi sge, %5, %22 : vector<1x128xi32>
    %24 = arith.andi %21, %23 : vector<1x128xi1>
    %cst_8 = arith.constant 0.000000e+00 : bf16
    %25 = vector.shape_cast %24 : vector<1x128xi1> to vector<1x128xi1>
    %26 = vector.broadcast %25 : vector<1x128xi1> to vector<4x128xi1>
    %27 = vector.broadcast %cst_8 : bf16 to vector<4x128xbf16>
    %28 = arith.select %26, %14, %27 : vector<4x128xi1>, vector<4x128xbf16>
    %c0_9 = arith.constant 0 : index
    %c0_10 = arith.constant 0 : index
    %c0_11 = arith.constant 0 : index
    %29 = vector.load %arg2[%c0_9, %c0_10, %c0_11] : memref<9x32x4xbf16, #tpu.memory_space<vmem>>, vector<1x32x4xbf16>
    %30 = vector.shape_cast %29 : vector<1x32x4xbf16> to vector<32x4xbf16>
    %cst_12 = arith.constant dense<0.000000e+00> : vector<32x128xf32>
    %31 = tpu.matmul %30, %28, %cst_12 {dimension_numbers = #tpu.dot_dimension_numbers<[1], [0], [0], [1], [0, 0, 1, 1], [], []>} : vector<32x4xbf16>, vector<4x128xbf16>, vector<32x128xf32> -> vector<32x128xf32>
    %32 = arith.addf %13, %31 : vector<32x128xf32>
    %33 = vector.extract_strided_slice %12 {offsets = [0, 112], sizes = [4, 128], strides = [1, 1]} : vector<4x384xbf16> to vector<4x128xbf16>
    %c-16_i32 = arith.constant -16 : i32
    %34 = vector.broadcast %c-16_i32 : i32 to vector<1x128xi32>
    %35 = arith.addi %3, %34 : vector<1x128xi32>
    %c0_i32_13 = arith.constant 0 : i32
    %36 = vector.broadcast %c0_i32_13 : i32 to vector<1x128xi32>
    %37 = arith.cmpi sge, %35, %36 : vector<1x128xi32>
    %c256_i32_14 = arith.constant 256 : i32
    %38 = vector.broadcast %c256_i32_14 : i32 to vector<1x128xi32>
    %39 = arith.cmpi slt, %35, %38 : vector<1x128xi32>
    %40 = arith.andi %37, %39 : vector<1x128xi1>
    %cst_15 = arith.constant 0.000000e+00 : bf16
    %41 = vector.shape_cast %40 : vector<1x128xi1> to vector<1x128xi1>
    %42 = vector.broadcast %41 : vector<1x128xi1> to vector<4x128xi1>
    %43 = vector.broadcast %cst_15 : bf16 to vector<4x128xbf16>
    %44 = arith.select %42, %33, %43 : vector<4x128xi1>, vector<4x128xbf16>
    %c1 = arith.constant 1 : index
    %c0_16 = arith.constant 0 : index
    %c0_17 = arith.constant 0 : index
    %45 = vector.load %arg2[%c1, %c0_16, %c0_17] : memref<9x32x4xbf16, #tpu.memory_space<vmem>>, vector<1x32x4xbf16>
    %46 = vector.shape_cast %45 : vector<1x32x4xbf16> to vector<32x4xbf16>
    %cst_18 = arith.constant dense<0.000000e+00> : vector<32x128xf32>
    %47 = tpu.matmul %46, %44, %cst_18 {dimension_numbers = #tpu.dot_dimension_numbers<[1], [0], [0], [1], [0, 0, 1, 1], [], []>} : vector<32x4xbf16>, vector<4x128xbf16>, vector<32x128xf32> -> vector<32x128xf32>
    %48 = arith.addf %32, %47 : vector<32x128xf32>
    %49 = vector.extract_strided_slice %12 {offsets = [0, 113], sizes = [4, 128], strides = [1, 1]} : vector<4x384xbf16> to vector<4x128xbf16>
    %c-15_i32 = arith.constant -15 : i32
    %50 = vector.broadcast %c-15_i32 : i32 to vector<1x128xi32>
    %51 = arith.addi %3, %50 : vector<1x128xi32>
    %c0_i32_19 = arith.constant 0 : i32
    %52 = vector.broadcast %c0_i32_19 : i32 to vector<1x128xi32>
    %53 = arith.cmpi sge, %51, %52 : vector<1x128xi32>
    %c256_i32_20 = arith.constant 256 : i32
    %54 = vector.broadcast %c256_i32_20 : i32 to vector<1x128xi32>
    %55 = arith.cmpi slt, %51, %54 : vector<1x128xi32>
    %56 = arith.andi %53, %55 : vector<1x128xi1>
    %c14_i32 = arith.constant 14 : i32
    %57 = vector.broadcast %c14_i32 : i32 to vector<1x128xi32>
    %58 = arith.cmpi sle, %5, %57 : vector<1x128xi32>
    %59 = arith.andi %56, %58 : vector<1x128xi1>
    %cst_21 = arith.constant 0.000000e+00 : bf16
    %60 = vector.shape_cast %59 : vector<1x128xi1> to vector<1x128xi1>
    %61 = vector.broadcast %60 : vector<1x128xi1> to vector<4x128xi1>
    %62 = vector.broadcast %cst_21 : bf16 to vector<4x128xbf16>
    %63 = arith.select %61, %49, %62 : vector<4x128xi1>, vector<4x128xbf16>
    %c2 = arith.constant 2 : index
    %c0_22 = arith.constant 0 : index
    %c0_23 = arith.constant 0 : index
    %64 = vector.load %arg2[%c2, %c0_22, %c0_23] : memref<9x32x4xbf16, #tpu.memory_space<vmem>>, vector<1x32x4xbf16>
    %65 = vector.shape_cast %64 : vector<1x32x4xbf16> to vector<32x4xbf16>
    %cst_24 = arith.constant dense<0.000000e+00> : vector<32x128xf32>
    %66 = tpu.matmul %65, %63, %cst_24 {dimension_numbers = #tpu.dot_dimension_numbers<[1], [0], [0], [1], [0, 0, 1, 1], [], []>} : vector<32x4xbf16>, vector<4x128xbf16>, vector<32x128xf32> -> vector<32x128xf32>
    %67 = arith.addf %48, %66 : vector<32x128xf32>
    %68 = vector.extract_strided_slice %12 {offsets = [0, 127], sizes = [4, 128], strides = [1, 1]} : vector<4x384xbf16> to vector<4x128xbf16>
    %c-1_i32 = arith.constant -1 : i32
    %69 = vector.broadcast %c-1_i32 : i32 to vector<1x128xi32>
    %70 = arith.addi %3, %69 : vector<1x128xi32>
    %c0_i32_25 = arith.constant 0 : i32
    %71 = vector.broadcast %c0_i32_25 : i32 to vector<1x128xi32>
    %72 = arith.cmpi sge, %70, %71 : vector<1x128xi32>
    %c256_i32_26 = arith.constant 256 : i32
    %73 = vector.broadcast %c256_i32_26 : i32 to vector<1x128xi32>
    %74 = arith.cmpi slt, %70, %73 : vector<1x128xi32>
    %75 = arith.andi %72, %74 : vector<1x128xi1>
    %c1_i32_27 = arith.constant 1 : i32
    %76 = vector.broadcast %c1_i32_27 : i32 to vector<1x128xi32>
    %77 = arith.cmpi sge, %5, %76 : vector<1x128xi32>
    %78 = arith.andi %75, %77 : vector<1x128xi1>
    %cst_28 = arith.constant 0.000000e+00 : bf16
    %79 = vector.shape_cast %78 : vector<1x128xi1> to vector<1x128xi1>
    %80 = vector.broadcast %79 : vector<1x128xi1> to vector<4x128xi1>
    %81 = vector.broadcast %cst_28 : bf16 to vector<4x128xbf16>
    %82 = arith.select %80, %68, %81 : vector<4x128xi1>, vector<4x128xbf16>
    %c3 = arith.constant 3 : index
    %c0_29 = arith.constant 0 : index
    %c0_30 = arith.constant 0 : index
    %83 = vector.load %arg2[%c3, %c0_29, %c0_30] : memref<9x32x4xbf16, #tpu.memory_space<vmem>>, vector<1x32x4xbf16>
    %84 = vector.shape_cast %83 : vector<1x32x4xbf16> to vector<32x4xbf16>
    %cst_31 = arith.constant dense<0.000000e+00> : vector<32x128xf32>
    %85 = tpu.matmul %84, %82, %cst_31 {dimension_numbers = #tpu.dot_dimension_numbers<[1], [0], [0], [1], [0, 0, 1, 1], [], []>} : vector<32x4xbf16>, vector<4x128xbf16>, vector<32x128xf32> -> vector<32x128xf32>
    %86 = arith.addf %67, %85 : vector<32x128xf32>
    %87 = vector.extract_strided_slice %12 {offsets = [0, 128], sizes = [4, 128], strides = [1, 1]} : vector<4x384xbf16> to vector<4x128xbf16>
    %c0_i32_32 = arith.constant 0 : i32
    %88 = vector.broadcast %c0_i32_32 : i32 to vector<1x128xi32>
    %89 = arith.addi %3, %88 : vector<1x128xi32>
    %c0_i32_33 = arith.constant 0 : i32
    %90 = vector.broadcast %c0_i32_33 : i32 to vector<1x128xi32>
    %91 = arith.cmpi sge, %89, %90 : vector<1x128xi32>
    %c256_i32_34 = arith.constant 256 : i32
    %92 = vector.broadcast %c256_i32_34 : i32 to vector<1x128xi32>
    %93 = arith.cmpi slt, %89, %92 : vector<1x128xi32>
    %94 = arith.andi %91, %93 : vector<1x128xi1>
    %cst_35 = arith.constant 0.000000e+00 : bf16
    %95 = vector.shape_cast %94 : vector<1x128xi1> to vector<1x128xi1>
    %96 = vector.broadcast %95 : vector<1x128xi1> to vector<4x128xi1>
    %97 = vector.broadcast %cst_35 : bf16 to vector<4x128xbf16>
    %98 = arith.select %96, %87, %97 : vector<4x128xi1>, vector<4x128xbf16>
    %c4 = arith.constant 4 : index
    %c0_36 = arith.constant 0 : index
    %c0_37 = arith.constant 0 : index
    %99 = vector.load %arg2[%c4, %c0_36, %c0_37] : memref<9x32x4xbf16, #tpu.memory_space<vmem>>, vector<1x32x4xbf16>
    %100 = vector.shape_cast %99 : vector<1x32x4xbf16> to vector<32x4xbf16>
    %cst_38 = arith.constant dense<0.000000e+00> : vector<32x128xf32>
    %101 = tpu.matmul %100, %98, %cst_38 {dimension_numbers = #tpu.dot_dimension_numbers<[1], [0], [0], [1], [0, 0, 1, 1], [], []>} : vector<32x4xbf16>, vector<4x128xbf16>, vector<32x128xf32> -> vector<32x128xf32>
    %102 = arith.addf %86, %101 : vector<32x128xf32>
    %103 = vector.extract_strided_slice %12 {offsets = [0, 129], sizes = [4, 128], strides = [1, 1]} : vector<4x384xbf16> to vector<4x128xbf16>
    %c1_i32_39 = arith.constant 1 : i32
    %104 = vector.broadcast %c1_i32_39 : i32 to vector<1x128xi32>
    %105 = arith.addi %3, %104 : vector<1x128xi32>
    %c0_i32_40 = arith.constant 0 : i32
    %106 = vector.broadcast %c0_i32_40 : i32 to vector<1x128xi32>
    %107 = arith.cmpi sge, %105, %106 : vector<1x128xi32>
    %c256_i32_41 = arith.constant 256 : i32
    %108 = vector.broadcast %c256_i32_41 : i32 to vector<1x128xi32>
    %109 = arith.cmpi slt, %105, %108 : vector<1x128xi32>
    %110 = arith.andi %107, %109 : vector<1x128xi1>
    %c14_i32_42 = arith.constant 14 : i32
    %111 = vector.broadcast %c14_i32_42 : i32 to vector<1x128xi32>
    %112 = arith.cmpi sle, %5, %111 : vector<1x128xi32>
    %113 = arith.andi %110, %112 : vector<1x128xi1>
    %cst_43 = arith.constant 0.000000e+00 : bf16
    %114 = vector.shape_cast %113 : vector<1x128xi1> to vector<1x128xi1>
    %115 = vector.broadcast %114 : vector<1x128xi1> to vector<4x128xi1>
    %116 = vector.broadcast %cst_43 : bf16 to vector<4x128xbf16>
    %117 = arith.select %115, %103, %116 : vector<4x128xi1>, vector<4x128xbf16>
    %c5 = arith.constant 5 : index
    %c0_44 = arith.constant 0 : index
    %c0_45 = arith.constant 0 : index
    %118 = vector.load %arg2[%c5, %c0_44, %c0_45] : memref<9x32x4xbf16, #tpu.memory_space<vmem>>, vector<1x32x4xbf16>
    %119 = vector.shape_cast %118 : vector<1x32x4xbf16> to vector<32x4xbf16>
    %cst_46 = arith.constant dense<0.000000e+00> : vector<32x128xf32>
    %120 = tpu.matmul %119, %117, %cst_46 {dimension_numbers = #tpu.dot_dimension_numbers<[1], [0], [0], [1], [0, 0, 1, 1], [], []>} : vector<32x4xbf16>, vector<4x128xbf16>, vector<32x128xf32> -> vector<32x128xf32>
    %121 = arith.addf %102, %120 : vector<32x128xf32>
    %122 = vector.extract_strided_slice %12 {offsets = [0, 143], sizes = [4, 128], strides = [1, 1]} : vector<4x384xbf16> to vector<4x128xbf16>
    %c15_i32_47 = arith.constant 15 : i32
    %123 = vector.broadcast %c15_i32_47 : i32 to vector<1x128xi32>
    %124 = arith.addi %3, %123 : vector<1x128xi32>
    %c0_i32_48 = arith.constant 0 : i32
    %125 = vector.broadcast %c0_i32_48 : i32 to vector<1x128xi32>
    %126 = arith.cmpi sge, %124, %125 : vector<1x128xi32>
    %c256_i32_49 = arith.constant 256 : i32
    %127 = vector.broadcast %c256_i32_49 : i32 to vector<1x128xi32>
    %128 = arith.cmpi slt, %124, %127 : vector<1x128xi32>
    %129 = arith.andi %126, %128 : vector<1x128xi1>
    %c1_i32_50 = arith.constant 1 : i32
    %130 = vector.broadcast %c1_i32_50 : i32 to vector<1x128xi32>
    %131 = arith.cmpi sge, %5, %130 : vector<1x128xi32>
    %132 = arith.andi %129, %131 : vector<1x128xi1>
    %cst_51 = arith.constant 0.000000e+00 : bf16
    %133 = vector.shape_cast %132 : vector<1x128xi1> to vector<1x128xi1>
    %134 = vector.broadcast %133 : vector<1x128xi1> to vector<4x128xi1>
    %135 = vector.broadcast %cst_51 : bf16 to vector<4x128xbf16>
    %136 = arith.select %134, %122, %135 : vector<4x128xi1>, vector<4x128xbf16>
    %c6 = arith.constant 6 : index
    %c0_52 = arith.constant 0 : index
    %c0_53 = arith.constant 0 : index
    %137 = vector.load %arg2[%c6, %c0_52, %c0_53] : memref<9x32x4xbf16, #tpu.memory_space<vmem>>, vector<1x32x4xbf16>
    %138 = vector.shape_cast %137 : vector<1x32x4xbf16> to vector<32x4xbf16>
    %cst_54 = arith.constant dense<0.000000e+00> : vector<32x128xf32>
    %139 = tpu.matmul %138, %136, %cst_54 {dimension_numbers = #tpu.dot_dimension_numbers<[1], [0], [0], [1], [0, 0, 1, 1], [], []>} : vector<32x4xbf16>, vector<4x128xbf16>, vector<32x128xf32> -> vector<32x128xf32>
    %140 = arith.addf %121, %139 : vector<32x128xf32>
    %141 = vector.extract_strided_slice %12 {offsets = [0, 144], sizes = [4, 128], strides = [1, 1]} : vector<4x384xbf16> to vector<4x128xbf16>
    %c16_i32 = arith.constant 16 : i32
    %142 = vector.broadcast %c16_i32 : i32 to vector<1x128xi32>
    %143 = arith.addi %3, %142 : vector<1x128xi32>
    %c0_i32_55 = arith.constant 0 : i32
    %144 = vector.broadcast %c0_i32_55 : i32 to vector<1x128xi32>
    %145 = arith.cmpi sge, %143, %144 : vector<1x128xi32>
    %c256_i32_56 = arith.constant 256 : i32
    %146 = vector.broadcast %c256_i32_56 : i32 to vector<1x128xi32>
    %147 = arith.cmpi slt, %143, %146 : vector<1x128xi32>
    %148 = arith.andi %145, %147 : vector<1x128xi1>
    %cst_57 = arith.constant 0.000000e+00 : bf16
    %149 = vector.shape_cast %148 : vector<1x128xi1> to vector<1x128xi1>
    %150 = vector.broadcast %149 : vector<1x128xi1> to vector<4x128xi1>
    %151 = vector.broadcast %cst_57 : bf16 to vector<4x128xbf16>
    %152 = arith.select %150, %141, %151 : vector<4x128xi1>, vector<4x128xbf16>
    %c7 = arith.constant 7 : index
    %c0_58 = arith.constant 0 : index
    %c0_59 = arith.constant 0 : index
    %153 = vector.load %arg2[%c7, %c0_58, %c0_59] : memref<9x32x4xbf16, #tpu.memory_space<vmem>>, vector<1x32x4xbf16>
    %154 = vector.shape_cast %153 : vector<1x32x4xbf16> to vector<32x4xbf16>
    %cst_60 = arith.constant dense<0.000000e+00> : vector<32x128xf32>
    %155 = tpu.matmul %154, %152, %cst_60 {dimension_numbers = #tpu.dot_dimension_numbers<[1], [0], [0], [1], [0, 0, 1, 1], [], []>} : vector<32x4xbf16>, vector<4x128xbf16>, vector<32x128xf32> -> vector<32x128xf32>
    %156 = arith.addf %140, %155 : vector<32x128xf32>
    %157 = vector.extract_strided_slice %12 {offsets = [0, 145], sizes = [4, 128], strides = [1, 1]} : vector<4x384xbf16> to vector<4x128xbf16>
    %c17_i32 = arith.constant 17 : i32
    %158 = vector.broadcast %c17_i32 : i32 to vector<1x128xi32>
    %159 = arith.addi %3, %158 : vector<1x128xi32>
    %c0_i32_61 = arith.constant 0 : i32
    %160 = vector.broadcast %c0_i32_61 : i32 to vector<1x128xi32>
    %161 = arith.cmpi sge, %159, %160 : vector<1x128xi32>
    %c256_i32_62 = arith.constant 256 : i32
    %162 = vector.broadcast %c256_i32_62 : i32 to vector<1x128xi32>
    %163 = arith.cmpi slt, %159, %162 : vector<1x128xi32>
    %164 = arith.andi %161, %163 : vector<1x128xi1>
    %c14_i32_63 = arith.constant 14 : i32
    %165 = vector.broadcast %c14_i32_63 : i32 to vector<1x128xi32>
    %166 = arith.cmpi sle, %5, %165 : vector<1x128xi32>
    %167 = arith.andi %164, %166 : vector<1x128xi1>
    %cst_64 = arith.constant 0.000000e+00 : bf16
    %168 = vector.shape_cast %167 : vector<1x128xi1> to vector<1x128xi1>
    %169 = vector.broadcast %168 : vector<1x128xi1> to vector<4x128xi1>
    %170 = vector.broadcast %cst_64 : bf16 to vector<4x128xbf16>
    %171 = arith.select %169, %157, %170 : vector<4x128xi1>, vector<4x128xbf16>
    %c8 = arith.constant 8 : index
    %c0_65 = arith.constant 0 : index
    %c0_66 = arith.constant 0 : index
    %172 = vector.load %arg2[%c8, %c0_65, %c0_66] : memref<9x32x4xbf16, #tpu.memory_space<vmem>>, vector<1x32x4xbf16>
    %173 = vector.shape_cast %172 : vector<1x32x4xbf16> to vector<32x4xbf16>
    %cst_67 = arith.constant dense<0.000000e+00> : vector<32x128xf32>
    %174 = tpu.matmul %173, %171, %cst_67 {dimension_numbers = #tpu.dot_dimension_numbers<[1], [0], [0], [1], [0, 0, 1, 1], [], []>} : vector<32x4xbf16>, vector<4x128xbf16>, vector<32x128xf32> -> vector<32x128xf32>
    %175 = arith.addf %156, %174 : vector<32x128xf32>
    %c0_68 = arith.constant 0 : index
    %c0_69 = arith.constant 0 : index
    %c0_70 = arith.constant 0 : index
    %176 = vector.load %arg6[%c0_68, %c0_69, %c0_70] : memref<1x32x128xf32, #tpu.memory_space<vmem>>, vector<1x32x128xf32>
    %177 = vector.shape_cast %176 : vector<1x32x128xf32> to vector<32x128xf32>
    %178 = vector.shape_cast %175 : vector<32x128xf32> to vector<1x32x128xf32>
    tpu.vector_store %arg6[%c0_68, %c0_69, %c0_70], %178 {strides = array<i32>} : memref<1x32x128xf32, #tpu.memory_space<vmem>>, vector<1x32x128xf32>,
    return
  }
  func.func @transform_0(%arg0: i32, %arg1: i32) -> (i32, i32, i32) {
    %c0_i32 = arith.constant 0 : i32
    %c0_i32_0 = arith.constant 0 : i32
    %c0_i32_1 = arith.constant 0 : i32
    %c0_i32_2 = arith.constant 0 : i32
    return %c0_i32, %c0_i32_0, %c0_i32_1 : i32, i32, i32
  }
  func.func @transform_1(%arg0: i32, %arg1: i32) -> (i32, i32, i32) {
    %c1_i32 = arith.constant 1 : i32
    %0 = arith.muli %arg1, %c1_i32 : i32
    %c1_i32_0 = arith.constant 1 : i32
    %1 = arith.subi %0, %c1_i32_0 : i32
    %c0_i32 = arith.constant 0 : i32
    %2 = arith.maxsi %1, %c0_i32 : i32
    %c0_i32_1 = arith.constant 0 : i32
    %c0_i32_2 = arith.constant 0 : i32
    return %arg0, %c0_i32_1, %2 : i32, i32, i32
  }
  func.func @transform_2(%arg0: i32, %arg1: i32) -> (i32, i32, i32) {
    %c0_i32 = arith.constant 0 : i32
    %c0_i32_0 = arith.constant 0 : i32
    return %arg0, %c0_i32, %arg1 : i32, i32, i32
  }
  func.func @transform_3(%arg0: i32, %arg1: i32) -> (i32, i32, i32) {
    %c1_i32 = arith.constant 1 : i32
    %0 = arith.addi %arg1, %c1_i32 : i32
    %c1_i32_0 = arith.constant 1 : i32
    %1 = arith.muli %0, %c1_i32_0 : i32
    %c1_i32_1 = arith.constant 1 : i32
    %2 = arith.minsi %1, %c1_i32_1 : i32
    %c0_i32 = arith.constant 0 : i32
    %c0_i32_2 = arith.constant 0 : i32
    return %arg0, %c0_i32, %2 : i32, i32, i32
  }
  func.func @transform_4(%arg0: i32, %arg1: i32) -> (i32, i32, i32) {
    %c0_i32 = arith.constant 0 : i32
    %c0_i32_0 = arith.constant 0 : i32
    return %arg0, %c0_i32, %arg1 : i32, i32, i32
  }
}

</mosaic_0001>

<bundles_post_ra>
// kernel: overlap_patch_embed.1
= control target key start
LH: loop header
LB: loop body
LE: loop exit
PB: predicated region body
PF: predicated region fallthrough
CT: control target
= control target key end

     0   :  { %s1481_s15 = smov 0   ;;  %s1483_s16 = smov 0   ;;  %s1954_s0 = inlined_call_operand.vmem [shape: bf16[9,32,4], index: 0, kind: input, shape index: {}]   ;;  %s1955_s1 = inlined_call_operand.vmem [shape: bf16[2,4,256], index: 1, kind: input, shape index: {}, may-alias: {1,2,3}]   ;;  %s1956_s2 = inlined_call_operand.vmem [shape: bf16[2,4,256], index: 2, kind: input, shape index: {}, may-alias: {1,2,3}]   ;;  %s1957_s3 = inlined_call_operand.vmem [shape: bf16[2,4,256], index: 3, kind: input, shape index: {}, may-alias: {1,2,3}]   ;;  %s1958_s4 = inlined_call_operand.vmem [shape: f32[2,32,256], index: 4, kind: output, shape index: {}]  }
   0x1   :  { %s1485_s17 = smov 0   ;;  %s1487_s18 = smov 0  }
   0x2   :  { %s1489_s19 = smov 0   ;;  %s1491_s20 = smov 0  }
   0x3   :  { %s1493_s21 = smov 0  }
   0x4 LB: > { %s23_s22 = sadd.s32 1, %s1437_s19  ;;  %s26_s23 = sadd.s32 1, %s1441_s20  ;;  %s1445_s21 = sphi %s1493_s21, %s14_s21   ;;  %s1441_s20 = sphi %s1491_s20, %s2006_s20   ;;  %s1437_s19 = sphi %s1489_s19, %s2005_s19   ;;  %s1433_s18 = sphi %s1487_s18, %s2004_s18   ;;  %s1429_s17 = sphi %s1485_s17, %s2003_s17   ;;  %s1425_s16 = sphi %s1483_s16, %s2002_s16   ;;  %s1421_s15 = sphi %s1481_s15, %s2001_s15  }
   0x5   : > { %p24_p0 = scmp.ge.s32.totalorder %s23_s22, 2  ;;  %s1154_s24 = sadd.s32 4294967295, %s1445_s21  }
   0x6   : > { %p162_p1 = scmp.ne.s32.totalorder %s1425_s16, %s1421_s15  ;;  %p163_p2 = scmp.eq.s32.totalorder %s1154_s24, 3 }
   0x7   : > { %s2008_s22 = smov (%p24_p0, %s23_s22), 0  ;;  %s2010_s23 = smov (!%p24_p0, %s26_s23), %s1441_s20 }
   0x8   : > { %s148_s25 = ssub.s32 %s1437_s19, %s2008_s22  ;;  %p28_p3 = scmp.ge.s32.totalorder %s2010_s23, 2 }
   0x9   : > { %p1160_p4 = scmp.ge.s32.totalorder %s1445_s21, 1  ;;  %p1527_p5 = por %p163_p2, %p162_p1 }
   0xa   : > { %p235_p6 = scmp.lt.s32.totalorder %s1445_s21, 5  ;;  %s2012_s23 = smov (%p28_p3, %s2010_s23), 0 }
   0xb   : > { %s147_s27 = ssub.s32 %s1441_s20, %s2012_s23  ;;  %s152_s29 = sadd.s32 1, %s1425_s16 }
   0xc   : > { %p236_p7 = pnand %p1160_p4, %p235_p6  ;;  %s149_s28 = sor.u32 %s148_s25, %s147_s27 }
   0xd   : > { %p150_p8 = scmp.eq.s32.totalorder %s149_s28, 0  ;;  %s1177_s5 = sshll.u32 (!%p236_p7), %s1429_s17, 7 }
   0xe   : > { %239 = sbr.rel (%p236_p7) target bundleno = 490 (0x1ea), region = 36  ;;  %s1448_s6 = smov (!%p236_p7), 112  }
   0xf   : > { %s1538_s30 = scalar_select %p150_p8, %s1425_s16, %s152_s29  }
  0x10   : > { %s1961_s7 = smov (!%p236_p7), 127   ;;  %s1450_s8 = smov (!%p236_p7), 113  }
  0x11   : > { %s1959_s9 = smov (!%p236_p7), 111   ;;  %s1452_s10 = smov (!%p236_p7), 15  }
  0x12   : > { %s1453_s11 = smov (!%p236_p7), 16   ;;  %s1454_s12 = smov (!%p236_p7), 1  }
  0x13   : > { %v325_v0 = vlaneseq  ;;  %v327_v1 = vstv %s1177_s5  ;;  %v1447_v10 = vmov 0   ;;  %s1455_s13 = smov 17   ;;  %s1162_s14 = sadd.s32 4294967295, %s1429_s17  ;;  %v1316_v53 = vld [vmem:[%s1954_s0 + $0x48] sm:$0xff] }
  0x14   : > { %p286_p9 = scmp.gt.s32.totalorder %s1162_s14, 0  ;;  %p288_p10 = scmp.lt.s32.totalorder %s1433_s18, 1  ;;  %v1607_v33 = vunpack.c.l.b16 %v1447_v10  ;;  %v1610_v34 = vunpack.c.h.b16 %v1447_v10  ;;  %v1320_v13 = vld [vmem:[%s1954_s0 + $0x68] sm:$0xff] }
  0x15   : > { %v326_v2 = vand.u32 127, %v325_v0  ;;  %p1163_p11 = scmp.lt.s32.totalorder %s1162_s14, 1  ;;  %p301_p12 = scmp.lt.s32.totalorder %s1429_s17, 1 }
  0x16   : > { %s2014_s14 = smov (!%p286_p9, %s1162_s14), 0 }
  0x17   : > { %v1541_v3 = vadd.s32 %v327_v1, %v326_v2  ;;  %s289_s24 = scalar_select %p288_p10, %s1433_s18, 1 }
  0x18   : > { %s2016_s14 = smov (!%p1163_p11, %s2014_s14), 1 }
  0x19   : > { %v359_v4 = vadd.s32 4294967280, %v1541_v3  ;;  %v329_v5 = vand.u32 15, %v1541_v3  ;;  %v555_v6 = vadd.s32 4294967295, %v1541_v3  ;;  %v478_v7 = vadd.s32 4294967281, %v1541_v3  ;;  %s1598_s25 = sshll.u32 %s289_s24, 1 }
  0x1a   : > { %v333_v9 = vadd.s32 4294967279, %v1541_v3  ;;  %v837_v14 = vadd.s32 16, %v1541_v3  ;;  %v761_v17 = vadd.s32 15, %v1541_v3  ;;  %v912_v20 = vadd.s32 17, %v1541_v3  ;;  %s293_s27 = sadd.s32 %s2016_s14, %s1598_s25 }
  0x1b   : > { %vm360_vm0 = vcmp.ge.s32.totalorder %v359_v4, 0  ;;  %vm361_vm1 = vcmp.lt.s32.totalorder %v359_v4, 256  ;;  %vm556_vm2 = vcmp.ge.s32.totalorder %v555_v6, 0  ;;  %vm1547_vm4 = vcmp.ge.s32.totalorder %v329_v5, 1  ;;  %s1169_s28 = sshll.u32 %s293_s27, 1 }
  0x1c   : > { %vm362_vm3 = vmand %vm360_vm0, %vm361_vm1  ;;  %vm557_vm5 = vcmp.lt.s32.totalorder %v555_v6, 256  ;;  %vm479_vm8 = vcmp.ge.s32.totalorder %v478_v7, 0  ;;  %vm480_vm9 = vcmp.lt.s32.totalorder %v478_v7, 256  ;;  %vm1555_vm11 = vcmp.le.s32.totalorder %v329_v5, 14  ;;  %s302_s29 = scalar_select %p301_p12, %s1429_s17, 1 }
  0x1d   : > { %vm365_vm6 = vmpackc.low %vm362_vm3, %vm362_vm3  ;;  %vm334_vm14 = vcmp.ge.s32.totalorder %v333_v9, 0  ;;  %vm335_vm15 = vcmp.lt.s32.totalorder %v333_v9, 256  ;;  %vm838_vm3 = vcmp.ge.s32.totalorder %v837_v14, 0  ;;  %v685_v24 = vadd.s32 1, %v1541_v3 }
  0x1e   : > { %v366_v11 = vsel %vm365_vm6, 65537, %v1447_v10  ;;  %vm558_vm7 = vmand %vm556_vm2, %vm557_vm5  ;;  %vm839_vm5 = vcmp.lt.s32.totalorder %v837_v14, 256  ;;  %s304_s24 = sadd.s32 %s1598_s25, %s302_s29 }
  0x1f   : > { %v367_v12 = vperm.slane %v366_v11, 0  ;;  %vm559_vm10 = vmand %vm558_vm7, %vm1547_vm4  ;;  %s1171_s14 = sshll.u32 %s304_s24, 1  ;;  %s1999_s24 = smov 127   ;;  %v1317_v11 = vld [vmem:[%s1954_s0 + $0x50] sm:$0xff] }
  0x20   : > { %vm562_vm12 = vmpackc.low %vm559_vm10, %vm559_vm10  ;;  %s306_s29 = scalar_lea.vmem %s1956_s2, %s1171_s14 }
  0x21   : > { %368 = vrot.lane.b32.xlu0 %v367_v12, %s1448_s6  ;;  %v563_v15 = vsel %vm562_vm12, 65537, %v1447_v10  ;;  %vm481_vm13 = vmand %vm479_vm8, %vm480_vm9  ;;  %vm762_vm8 = vcmp.ge.s32.totalorder %v761_v17, 0  ;;  %vm763_vm9 = vcmp.lt.s32.totalorder %v761_v17, 256  ;;  %v1665_v51 = vld [vmem:[%s306_s29] sm:$0x3]  ;;  %v1321_v12 = vld [vmem:[%s1954_s0 + $0x70] sm:$0xff] }
  0x22   : > { %v564_v16 = vperm.slane %v563_v15, 0  ;;  %vm483_vm0 = vmand %vm481_vm13, %vm1555_vm11  ;;  %v1318_v15 = vld [vmem:[%s1954_s0 + $0x58] sm:$0xff] }
  0x23   : > { %vm486_vm1 = vmpackc.low %vm483_vm0, %vm483_vm0 }
  0x24   : > { %565 = vrot.lane.b32.xlu1 %v564_v16, %s1961_s7  ;;  %v487_v18 = vsel %vm486_vm1, 65537, %v1447_v10  ;;  %vm336_vm2 = vmand %vm334_vm14, %vm335_vm15  ;;  %vm913_vm14 = vcmp.ge.s32.totalorder %v912_v20, 0  ;;  %vm914_vm15 = vcmp.lt.s32.totalorder %v912_v20, 256  ;;  %s295_s7 = scalar_lea.vmem %s1955_s1, %s1169_s28  ;;  %v1322_v16 = vld [vmem:[%s1954_s0 + $0x78] sm:$0xff]  ;;  %s282_s28 = sand.u32 1, %s1421_s15  }
  0x25   : > { %v488_v19 = vperm.slane %v487_v18, 0  ;;  %vm338_vm6 = vmand %vm336_vm2, %vm1547_vm4  ;;  %v1613_v38 = vld [vmem:[%s295_s7] sm:$0x3]  ;;  %s1161_s29 = sshll.u32 %s282_s28, 5  ;;  %s1301_s15 = sshll.u32 (%p1527_p5), %s1433_s18, 3 }
  0x26   : > { %vm341_vm7 = vmpackc.low %vm338_vm6, %vm338_vm6 }
  0x27   : > { %v342_v21 = vsel %vm341_vm7, 65537, %v1447_v10  ;;  %vm1571_vm10 = vmand %vm838_vm3, %vm839_vm5  ;;  %vm686_vm3 = vcmp.ge.s32.totalorder %v685_v24, 0  ;;  %vm687_vm5 = vcmp.lt.s32.totalorder %v685_v24, 256 }
  0x28   : > { %v343_v23 = vperm.slane %v342_v21, 0  ;;  %vm843_vm12 = vmpackc.low %vm1571_vm10, %vm1571_vm10 }
  0x29   : > { %489 = vrot.lane.b32.xlu0 %v488_v19, %s1450_s8  ;;  %vm764_vm13 = vmand %vm762_vm8, %vm763_vm9  ;;  %v844_v26 = vsel %vm843_vm12, 65537, %v1447_v10 }
  0x2a   : > { %vm765_vm0 = vmand %vm764_vm13, %vm1547_vm4  ;;  %v845_v28 = vperm.slane %v844_v26, 0 }
  0x2b   : > { %vm768_vm1 = vmpackc.low %vm765_vm0, %vm765_vm0 }
  0x2c   : > { %344 = vrot.lane.b32.xlu1 %v343_v23, %s1959_s9  ;;  %v769_v25 = vsel %vm768_vm1, 65537, %v1447_v10  ;;  %vm915_vm2 = vmand %vm913_vm14, %vm914_vm15  ;;  %s307_s9 = sadd.s32 1, %s1429_s17 }
  0x2d   : > { %v770_v27 = vperm.slane %v769_v25, 0  ;;  %vm916_vm6 = vmand %vm915_vm2, %vm1555_vm11  ;;  %p1647_p13 = scmp.lt.s32.totalorder %s307_s9, 1 }
  0x2e   : > { %vm919_vm7 = vmpackc.low %vm916_vm6, %vm916_vm6 }
  0x2f   : > { %vm688_vm8 = vmand %vm686_vm3, %vm687_vm5  ;;  %v920_v29 = vsel %vm919_vm7, 65537, %v1447_v10  ;;  %s2018_s9 = smov (!%p1647_p13, %s307_s9), 1 }
  0x30   : > { %vm689_vm4 = vmand %vm688_vm8, %vm1555_vm11  ;;  %v921_v32 = vperm.slane %v920_v29, 0  ;;  %s2020_s9 = smov (!%p1647_p13, %s2018_s9), 1 }
  0x31   : > { %771 = vrot.lane.b32.xlu0 %v770_v27, %s1452_s10  ;;  %vm692_vm9 = vmpackc.low %vm689_vm4, %vm689_vm4 }
  0x32   : > { %v693_v30 = vsel %vm692_vm9, 65537, %v1447_v10  ;;  %v1323_v10 = vld [vmem:[%s1954_s0 + $0x80] sm:$0xff] }
  0x33   : > { %v694_v31 = vperm.slane %v693_v30, 0 }
  0x34   : > { %846 = vrot.lane.b32.xlu1 %v845_v28, %s1453_s11 }
  0x35   : > { %695 = vrot.lane.b32.xlu2 %v694_v31, %s1454_s12 }
  0x39   : > { %922 = vrot.lane.b32.xlu0 %v921_v32, %s1455_s13 }
  0x8f   : > { %v696_v1 = vpop.permute.xlu2 %695 }
  0x90   : > { %v697_v6 = vunpack.c.l.b16 %v696_v1  ;;  %v698_v7 = vunpack.c.h.b16 %v696_v1 }
  0x93   : > { %v369_v35 = vpop.permute.xlu0 %368 }
  0x94   : > { %v370_v36 = vunpack.c.l.b16 %v369_v35  ;;  %v371_v37 = vunpack.c.h.b16 %v369_v35 }
  0x96   : > { %v566_v39 = vpop.permute.xlu1 %565  ;;  %vm1616_vm11 = vcmp.ne.s32.totalorder %v370_v36, %v1607_v33  ;;  %vm1621_vm10 = vcmp.ne.s32.totalorder %v371_v37, %v1610_v34  ;;  %v1315_v37 = vld [vmem:[%s1954_s0 + $0x40] sm:$0xff] }
  0x97   : > { %v567_v42 = vunpack.c.l.b16 %v566_v39  ;;  %v568_v43 = vunpack.c.h.b16 %v566_v39  ;;  %vm376_vm12 = vmpackc.low %vm1621_vm10, %vm1616_vm11 }
  0x98   : > { %v377_v44 = vsel %vm376_vm12, %v1613_v38, 0  ;;  %v378_v58 = vsel %vm376_vm12, %v1665_v51, 0  ;;  %vm1773_vm12 = vcmp.ne.s32.totalorder %v697_v6, %v1607_v33 }
  0x99   : > { %396 = vrot.lane.b32.xlu2 %v377_v44, %s1453_s11  ;;  %vm1638_vm13 = vcmp.ne.s32.totalorder %v567_v42, %v1607_v33  ;;  %vm1643_vm14 = vcmp.ne.s32.totalorder %v568_v43, %v1610_v34  ;;  %v1311_v43 = vld [vmem:[%s1954_s0 + $0x20] sm:$0xff] }
  0x9a   : > { %vm573_vm15 = vmpackc.low %vm1643_vm14, %vm1638_vm13  ;;  %vm1778_vm13 = vcmp.ne.s32.totalorder %v698_v7, %v1610_v34 }
  0x9b   : > { %v574_v47 = vsel %vm573_vm15, %v1613_v38, 0  ;;  %v490_v48 = vpop.permute.xlu0 %489  ;;  %v575_v8 = vsel %vm573_vm15, %v1665_v51, 0  ;;  %vm703_vm14 = vmpackc.low %vm1778_vm13, %vm1773_vm12  ;;  %vm803_vm12 = vcmask 924672   ;;  %vm727_vm13 = vcmask 1039360  }
  0x9c   : > { %593 = vrot.lane.b32.xlu0 %v574_v47, %s1454_s12  ;;  %v491_v49 = vunpack.c.l.b16 %v490_v48  ;;  %v492_v50 = vunpack.c.h.b16 %v490_v48  ;;  %v704_v27 = vsel %vm703_vm14, %v1665_v51, 0  ;;  %v1307_v47 = vld [vmem:[%s1954_s0] sm:$0xff] }
  0x9e   : > { %v345_v52 = vpop.permute.xlu1 %344  ;;  %vm1670_vm0 = vcmp.ne.s32.totalorder %v491_v49, %v1607_v33  ;;  %vm1675_vm1 = vcmp.ne.s32.totalorder %v492_v50, %v1610_v34 }
  0x9f   : > { %v346_v55 = vunpack.c.l.b16 %v345_v52  ;;  %v347_v56 = vunpack.c.h.b16 %v345_v52  ;;  %vm497_vm2 = vmpackc.low %vm1675_vm1, %vm1670_vm0  ;;  %v1313_v52 = vld [vmem:[%s1954_s0 + $0x30] sm:$0xff] }
  0xa0   : > { %v498_v57 = vsel %vm497_vm2, %v1613_v38, 0  ;;  %v499_v9 = vsel %vm497_vm2, %v1665_v51, 0  ;;  %vm400_vm2 = vcmask 130048  }
  0xa1   : > { %517 = vrot.lane.b32.xlu1 %v498_v57, %s1452_s10  ;;  %398 = vrot.lane.b32.xlu2 %v378_v58, %s1453_s11  ;;  %vm1698_vm3 = vcmp.ne.s32.totalorder %v346_v55, %v1607_v33  ;;  %vm1703_vm5 = vcmp.ne.s32.totalorder %v347_v56, %v1610_v34  ;;  %s315_s11 = sadd.s32 %s1598_s25, %s2020_s9  ;;  %v1312_v58 = vld [vmem:[%s1954_s0 + $0x28] sm:$0xff] }
  0xa2   : > { %vm352_vm6 = vmpackc.low %vm1703_vm5, %vm1698_vm3  ;;  %s1176_s25 = sshll.u32 %s315_s11, 1  ;;  %vm409_vm3 = vcmask 1041408   ;;  %vm631_vm5 = vcmp.ge.s32.totalorder %v1541_v3, 0  ;;  %s1916_s11 = scalar_lea.vmem [#allocation2], %s1161_s29 }
  0xa3   : > { %v354_v61 = vsel %vm352_vm6, %v1665_v51, 0  ;;  %v772_v62 = vpop.permute.xlu0 %771  ;;  %s317_s5 = scalar_lea.vmem %s1957_s3, %s1176_s25  ;;  %v353_v19 = vsel %vm352_vm6, %v1613_v38, 0  ;;  %vm632_vm6 = vcmp.lt.s32.totalorder %v1541_v3, 256  ;;  %s1000_s25 = sadd.s32 (%p1527_p5), %s1429_s17, %s1301_s15 }
  0xa4   : > { %446 = vrot.lane.b32.xlu0 %v354_v61, %s1455_s13  ;;  %v773_v63 = vunpack.c.l.b16 %v772_v62  ;;  %v774_v0 = vunpack.c.h.b16 %v772_v62  ;;  %v332_v18 = vld [vmem:[%s317_s5] sm:$0x3] }
  0xa5   : > { %v705_v20 = vsel %vm703_vm14, %v332_v18, 0  ;;  %vm878_vm14 = vcmask 916480  }
  0xa6   : > { %v847_v2 = vpop.permute.xlu1 %846  ;;  %vm1734_vm7 = vcmp.ne.s32.totalorder %v773_v63, %v1607_v33  ;;  %vm1739_vm8 = vcmp.ne.s32.totalorder %v774_v0, %v1610_v34  ;;  %v1308_v63 = vld [vmem:[%s1954_s0 + $0x8] sm:$0xff] }
  0xa7   : > { %v848_v4 = vunpack.c.l.b16 %v847_v2  ;;  %v849_v5 = vunpack.c.h.b16 %v847_v2  ;;  %vm779_vm10 = vmpackc.low %vm1739_vm8, %vm1734_vm7 }
  0xa8   : > { %v780_v17 = vsel %vm779_vm10, %v1665_v51, 0  ;;  %v781_v25 = vsel %vm779_vm10, %v332_v18, 0  ;;  %vm633_vm7 = vmand %vm631_vm5, %vm632_vm6  ;;  %vm597_vm10 = vcmask 7168  }
  0xa9   : > { %595 = vrot.lane.b32.xlu1 %v575_v8, %s1454_s12  ;;  %519 = vrot.lane.b32.xlu2 %v499_v9, %s1452_s10  ;;  %vm1746_vm4 = vcmp.ne.s32.totalorder %v848_v4, %v1607_v33  ;;  %vm1751_vm9 = vcmp.ne.s32.totalorder %v849_v5, %v1610_v34  ;;  %vm636_vm8 = vmpackc.low %vm633_vm7, %vm633_vm7  ;;  %v1314_v4 = vld [vmem:[%s1954_s0 + $0x38] sm:$0xff]  ;;  %v1319_v9 = vld [vmem:[%s1954_s0 + $0x60] sm:$0xff]  ;;  %s1302_s10 = sshll.u32 (%p1527_p5), %s1000_s25, 3 }
  0xaa   : > { %vm854_vm11 = vmpackc.low %vm1751_vm9, %vm1746_vm4  ;;  %vm402_vm4 = vcmask 31744   ;;  %v637_v35 = vsel %vm636_vm8, %v1665_v51, 0  ;;  %vm521_vm9 = vcmask 121856  }
  0xab   : > { %v855_v14 = vsel %vm854_vm11, %v1665_v51, 0  ;;  %v923_v21 = vpop.permute.xlu0 %922  ;;  %v856_v24 = vsel %vm854_vm11, %v332_v18, 0  ;;  %v660_v3 = vsel %vm409_vm3, %v637_v35, 0  ;;  %vm448_vm11 = vcmask 138240  }
  0xac   : > { %874 = vrot.lane.b32.xlu0 %v855_v14, %s1448_s6  ;;  %v924_v22 = vunpack.c.l.b16 %v923_v21  ;;  %v925_v23 = vunpack.c.h.b16 %v923_v21  ;;  %v1324_v14 = vld [vmem:[%s1954_s0 + $0x88] sm:$0xff] }
  0xae   : > { %vm928_vm15 = vcmp.ne.s32.totalorder %v924_v22, %v1607_v33  ;;  %vm929_vm0 = vcmp.ne.s32.totalorder %v925_v23, %v1610_v34  ;;  %v1310_v33 = vld [vmem:[%s1954_s0 + $0x18] sm:$0xff]  ;;  %v1309_v34 = vld [vmem:[%s1954_s0 + $0x10] sm:$0xff] }
  0xaf   : > { %vm930_vm1 = vmpackc.low %vm929_vm0, %vm928_vm15  ;;  %vm954_vm15 = vcmask 908288  }
  0xb0   : > { %v931_v26 = vsel %vm930_vm1, %v1665_v51, 0  ;;  %v932_v28 = vsel %vm930_vm1, %v332_v18, 0 }
  0xb1   : > { %799 = vrot.lane.b32.xlu1 %v780_v17, %s1450_s8  ;;  %444 = vrot.lane.b32.xlu2 %v353_v19, %s1455_s13  ;;  %s2000_s13 = smov 111  }
  0xb4   : > { %725 = vrot.lane.b32.xlu0 %v705_v20, %s1999_s24 }
  0xb9   : > { %876 = vrot.lane.b32.xlu1 %v856_v24, %s1448_s6  ;;  %801 = vrot.lane.b32.xlu2 %v781_v25, %s1450_s8 }
  0xc1   : > { %950 = vrot.lane.b32.xlu1 %v931_v26, %s2000_s13  ;;  %723 = vrot.lane.b32.xlu2 %v704_v27, %s1999_s24  ;;  %s1002_s24 = scalar_lea.vmem (%p1527_p5), %s1958_s4, %s1302_s10 }
  0xc9   : > { %952 = vrot.lane.b32.xlu2 %v932_v28, %s2000_s13 }
  0xf3   : > { %v397_v29 = vpop.permute.xlu2 %396 }
  0xfb   : > { %v399_v30 = vpop.permute.xlu2 %398 }
  0xfc   : > { %v401_v31 = vsel %vm400_vm2, %v397_v29, %v399_v30 }
  0xfd   : > { %v411_v32 = vsel %vm409_vm3, %v401_v31, 0 }
  0xfe   : > { %420 = vmatpush.bf16.msra.mxu0 %v411_v32  ;;  %1325 = vmatpush.bf16.msra.mxu1 %v411_v32 }
 0x101   : > { %1191 = vmatmul.msk.bf16.vlgmr.msra.gmra.mxu1 %vm402_vm4, %v1310_v33  ;;  %1190 = vmatmul.msk.bf16.vlgmr.msra.gmra.mxu0 %vm402_vm4, %v1309_v34 }
 0x102   : > { %669 = vmatpush.bf16.msrb.mxu0 %v660_v3 }
 0x103   : > { %v520_v36 = vpop.permute.xlu2 %519 }
 0x10b   : > { %v445_v40 = vpop.permute.xlu2 %444 }
 0x10e   : > { %v594_v38 = vpop.permute.xlu0 %593 }
 0x111   : > { %1242 = vmatmul.msk.bf16.vlgmr.msrb.gmra.mxu0 %vm402_vm4, %v1315_v37 }
 0x113   : > { %v518_v39 = vpop.permute.xlu1 %517  ;;  %v802_v49 = vpop.permute.xlu2 %801 }
 0x114   : > { %v522_v41 = vsel %vm521_vm9, %v518_v39, %v520_v36 }
 0x115   : > { %v530_v42 = vsel %vm409_vm3, %v522_v41, 0 }
 0x116   : > { %v447_v44 = vpop.permute.xlu0 %446  ;;  %539 = vmatpush.bf16.msra.mxu2 %v530_v42 }
 0x117   : > { %v449_v45 = vsel %vm448_vm11, %v445_v40, %v447_v44 }
 0x118   : > { %v457_v46 = vsel %vm409_vm3, %v449_v45, 0 }
 0x119   : > { %466 = vmatpush.bf16.msrb.mxu1 %v457_v46  ;;  %1214 = vmatmul.msk.bf16.vlgmr.msra.gmra.mxu2 %vm402_vm4, %v1311_v43 }
 0x11b   : > { %v596_v48 = vpop.permute.xlu1 %595  ;;  %v724_v59 = vpop.permute.xlu2 %723 }
 0x11c   : > { %1200 = vmatmul.msk.bf16.vlgmr.msrb.gmra.mxu1 %vm402_vm4, %v1307_v47  ;;  %v598_v50 = vsel %vm597_vm10, %v594_v38, %v596_v48 }
 0x11d   : > { %v606_v51 = vsel %vm409_vm3, %v598_v50, 0 }
 0x11e   : > { %v875_v54 = vpop.permute.xlu0 %874  ;;  %615 = vmatpush.bf16.msra.mxu3 %v606_v51 }
 0x121   : > { %1228 = vmatmul.msk.bf16.vlgmr.msra.gmra.mxu3 %vm402_vm4, %v1313_v52  ;;  %1243 = vmatmul.msk.bf16.gmra.mxu0 %vm402_vm4, %v1316_v53 }
 0x123   : > { %v800_v55 = vpop.permute.xlu1 %799  ;;  %v953_v5 = vpop.permute.xlu2 %952 }
 0x124   : > { %v804_v56 = vsel %vm803_vm12, %v800_v55, %v802_v49 }
 0x125   : > { %v812_v57 = vsel %vm409_vm3, %v804_v56, 0 }
 0x126   : > { %v726_v60 = vpop.permute.xlu0 %725  ;;  %821 = vmatpush.bf16.msrb.mxu2 %v812_v57 }
 0x127   : > { %v728_v61 = vsel %vm727_vm13, %v724_v59, %v726_v60 }
 0x128   : > { %v736_v62 = vsel %vm409_vm3, %v728_v61, 0 }
 0x129   : > { %745 = vmatpush.bf16.msra.mxu1 %v736_v62  ;;  %1215 = vmatmul.msk.bf16.gmra.mxu2 %vm402_vm4, %v1312_v58 }
 0x12b   : > { %v877_v0 = vpop.permute.xlu1 %876 }
 0x12c   : > { %1201 = vmatmul.msk.bf16.gmra.mxu1 %vm402_vm4, %v1308_v63  ;;  %v879_v1 = vsel %vm878_vm14, %v875_v54, %v877_v0 }
 0x12d   : > { %v887_v2 = vsel %vm409_vm3, %v879_v1, 0 }
 0x12e   : > { %896 = vmatpush.bf16.msrb.mxu3 %v887_v2 }
 0x131   : > { %1229 = vmatmul.msk.bf16.gmra.mxu3 %vm402_vm4, %v1314_v4 }
 0x133   : > { %v951_v6 = vpop.permute.xlu1 %950 }
 0x134   : > { %v955_v7 = vsel %vm954_vm15, %v951_v6, %v953_v5 }
 0x135   : > { %v963_v8 = vsel %vm409_vm3, %v955_v7, 0 }
 0x136   : > { %972 = vmatpush.bf16.msra.mxu0 %v963_v8 }
 0x139   : > { %1270 = vmatmul.msk.bf16.vlgmr.msrb.gmra.mxu2 %vm402_vm4, %v1319_v9  ;;  %1298 = vmatmul.msk.bf16.vlgmr.msra.gmra.mxu0 %vm402_vm4, %v1323_v10 }
 0x13c   : > { %1256 = vmatmul.msk.bf16.vlgmr.msra.gmra.mxu1 %vm402_vm4, %v1317_v11 }
 0x141   : > { %1284 = vmatmul.msk.bf16.vlgmr.msrb.gmra.mxu3 %vm402_vm4, %v1321_v12 }
 0x149   : > { %1271 = vmatmul.msk.bf16.gmra.mxu2 %vm402_vm4, %v1320_v13  ;;  %1299 = vmatmul.msk.bf16.gmra.mxu0 %vm402_vm4, %v1324_v14 }
 0x14c   : > { %1257 = vmatmul.msk.bf16.gmra.mxu1 %vm402_vm4, %v1318_v15 }
 0x151   : > { %1285 = vmatmul.msk.bf16.gmra.mxu3 %vm402_vm4, %v1322_v16 }
 0x17e   : > { %v422_v17 = vpop.f32.mrf.mxu0  ;;  %v427_v18 = vpop.f32.mrf.mxu1 }
 0x186   : > { %v424_v19 = vpop.f32.mrf.mxu0  ;;  %v429_v20 = vpop.f32.mrf.mxu1 }
 0x18e   : > { %v671_v21 = vpop.f32.mrf.mxu0 }
 0x196   : > { %v673_v25 = vpop.f32.mrf.mxu0 }
 0x199   : > { %v468_v22 = vpop.f32.mrf.mxu1 }
 0x19a   : > { %v469_v3 = vadd.f32 %v468_v22, %v422_v17 }
 0x19c   : > { %v541_v23 = vpop.f32.mrf.mxu2 }
 0x19d   : > { %v551_v36 = vadd.f32 %v541_v23, %v469_v3 }
 0x19e   : > { %v676_v29 = vpop.f32.mrf.mxu0 }
 0x1a1   : > { %v470_v24 = vpop.f32.mrf.mxu1 }
 0x1a2   : > { %v471_v41 = vadd.f32 %v470_v24, %v424_v19 }
 0x1a4   : > { %v543_v26 = vpop.f32.mrf.mxu2  ;;  %v617_v27 = vpop.f32.mrf.mxu3 }
 0x1a5   : > { %v627_v38 = vadd.f32 %v617_v27, %v551_v36  ;;  %v552_v44 = vadd.f32 %v543_v26, %v471_v41 }
 0x1a6   : > { %v678_v35 = vpop.f32.mrf.mxu0 }
 0x1a7   : > { %v681_v42 = vadd.f32 %v671_v21, %v627_v38 }
 0x1a9   : > { %v473_v28 = vpop.f32.mrf.mxu1 }
 0x1aa   : > { %v474_v52 = vadd.f32 %v473_v28, %v427_v18 }
 0x1ac   : > { %v546_v30 = vpop.f32.mrf.mxu2  ;;  %v619_v31 = vpop.f32.mrf.mxu3 }
 0x1ad   : > { %v628_v47 = vadd.f32 %v619_v31, %v552_v44  ;;  %v553_v55 = vadd.f32 %v546_v30, %v474_v52 }
 0x1af   : > { %v682_v53 = vadd.f32 %v673_v25, %v628_v47 }
 0x1b1   : > { %v475_v32 = vpop.f32.mrf.mxu1 }
 0x1b2   : > { %v476_v0 = vadd.f32 %v475_v32, %v429_v20 }
 0x1b4   : > { %v548_v33 = vpop.f32.mrf.mxu2  ;;  %v622_v34 = vpop.f32.mrf.mxu3 }
 0x1b5   : > { %v629_v58 = vadd.f32 %v622_v34, %v553_v55  ;;  %v554_v4 = vadd.f32 %v548_v33, %v476_v0 }
 0x1b6   : > { %v974_v43 = vpop.f32.mrf.mxu0 }
 0x1b7   : > { %v683_v1 = vadd.f32 %v676_v29, %v629_v58 }
 0x1b9   : > { %v747_v37 = vpop.f32.mrf.mxu1 }
 0x1ba   : > { %v757_v45 = vadd.f32 %v747_v37, %v681_v42 }
 0x1bc   : > { %v624_v39 = vpop.f32.mrf.mxu3  ;;  %v823_v40 = vpop.f32.mrf.mxu2 }
 0x1bd   : > { %v833_v48 = vadd.f32 %v823_v40, %v757_v45  ;;  %v630_v6 = vadd.f32 %v624_v39, %v554_v4 }
 0x1be   : > { %v976_v57 = vpop.f32.mrf.mxu0 }
 0x1bf   : > { %v684_v12 = vadd.f32 %v678_v35, %v630_v6 }
 0x1c1   : > { %v749_v46 = vpop.f32.mrf.mxu1 }
 0x1c2   : > { %v758_v56 = vadd.f32 %v749_v46, %v682_v53 }
 0x1c4   : > { %v825_v49 = vpop.f32.mrf.mxu2  ;;  %v898_v50 = vpop.f32.mrf.mxu3 }
 0x1c5   : > { %v908_v51 = vadd.f32 %v898_v50, %v833_v48  ;;  %v834_v59 = vadd.f32 %v825_v49, %v758_v56 }
 0x1c6   : > { %v979_v9 = vpop.f32.mrf.mxu0 }
 0x1c7   : > { %v984_v54 = vadd.f32 %v974_v43, %v908_v51 }
 0x1c9   : > { %988 = vst [vmem:[%s1916_s11] sm:$0xff] %v984_v54  ;;  %v752_v60 = vpop.f32.mrf.mxu1 }
 0x1ca   : > { %v759_v5 = vadd.f32 %v752_v60, %v683_v1 }
 0x1cc   : > { %v900_v61 = vpop.f32.mrf.mxu3  ;;  %v828_v63 = vpop.f32.mrf.mxu2 }
 0x1cd   : > { %v909_v62 = vadd.f32 %v900_v61, %v834_v59  ;;  %v835_v7 = vadd.f32 %v828_v63, %v759_v5 }
 0x1ce   : > { %v981_v19 = vpop.f32.mrf.mxu0 }
 0x1cf   : > { %v985_v2 = vadd.f32 %v976_v57, %v909_v62 }
 0x1d0   : > { %v1037_v21 = vld [vmem:[%s1916_s11] sm:$0xff] (%p1527_p5) }
 0x1d1   : > { %989 = vst [vmem:[%s1916_s11 + $0x8] sm:$0xff] %v985_v2  ;;  %v754_v11 = vpop.f32.mrf.mxu1 }
 0x1d2   : > { %v760_v15 = vadd.f32 %v754_v11, %v684_v12  ;;  %1038 = vst [vmem:[%s1002_s24] sm:$0xff] (%p1527_p5), %v1037_v21 }
 0x1d4   : > { %v903_v8 = vpop.f32.mrf.mxu3  ;;  %v830_v14 = vpop.f32.mrf.mxu2 }
 0x1d5   : > { %v910_v10 = vadd.f32 %v903_v8, %v835_v7  ;;  %v836_v16 = vadd.f32 %v830_v14, %v760_v15 }
 0x1d7   : > { %v986_v13 = vadd.f32 %v979_v9, %v910_v10 }
 0x1d8   : > { %v1039_v22 = vld [vmem:[%s1916_s11 + $0x8] sm:$0xff] (%p1527_p5) }
 0x1d9   : > { %990 = vst [vmem:[%s1916_s11 + $0x10] sm:$0xff] %v986_v13 }
 0x1da   : > { %1040 = vst [vmem:[%s1002_s24 + $0x10] sm:$0xff] (%p1527_p5), %v1039_v22 }
 0x1dc   : > { %v905_v17 = vpop.f32.mrf.mxu3 }
 0x1dd   : > { %v911_v18 = vadd.f32 %v905_v17, %v836_v16  ;;  %998 = sbr.rel (!%p1527_p5) target bundleno = 490 (0x1ea), region = 40 }
 0x1df   : > { %v987_v20 = vadd.f32 %v981_v19, %v911_v18 }
 0x1e0   : > { %v1041_v23 = vld [vmem:[%s1916_s11 + $0x10] sm:$0xff] (%p1527_p5) }
 0x1e1   : > { %991 = vst [vmem:[%s1916_s11 + $0x18] sm:$0xff] %v987_v20 }
 0x1e2   : > { %1042 = vst [vmem:[%s1002_s24 + $0x20] sm:$0xff] %v1041_v23 }
 0x1e8   : > { %v1043_v24 = vld [vmem:[%s1916_s11 + $0x18] sm:$0xff] }
 0x1e9   : > { %1044 = vst [vmem:[%s1002_s24 + $0x30] sm:$0xff] %v1043_v24 }
 0x1ea PF: > { %s14_s21 = sadd.s32 1, %s1445_s21   ;;  %s2001_s15 = smov %s1425_s16 }
 0x1eb   : > { %p11_p0 = scmp.ge.s32.totalorder %s14_s21, 6   ;;  %s2002_s16 = smov %s1538_s30 }
 0x1ec   : > { %s2003_s17 = smov %s1437_s19  ;;  %s2004_s18 = smov %s1441_s20 }
 0x1ed   : > { %s2005_s19 = smov %s2008_s22  ;;  %s2006_s20 = smov %s2012_s23 }
 0x1ee   :  { %13 = sbr.rel (!%p11_p0) target bundleno = 4 (0x4), region = 118 }

</bundles_post_ra>
